<compile_context>
chip_gen: v6e
topology: v6e:2x2x1
jax: 0.10.0
libtpu: 0.0.40
codegen_flags: <defaults>
</compile_context>

<pallas_src>
import math

import jax
import jax.numpy as jnp
import numpy as np
from jax.experimental import pallas as pl
from jax.experimental.pallas import tpu as pltpu

_MIB = 1024 * 1024


# ----------------------------------------------------------------------------
# kernel
# ----------------------------------------------------------------------------
def _swiglu_kernel(x_ref, w12_ref, w3_ref, b12_ref, b3_ref, o_ref, *scratch):
    """One (row-tile i, dff-tile j) step of
         out = (silu(x@W1 + b1) * (x@W2 + b2)) @ W3 + b3
       accumulated over the dff axis j.

       W1||W2 (and b1||b2) are packed per dff tile so both gate projections are a
       single MXU matmul; x1/x2 are recovered with static lane slices.  When no
       scratch is passed the f32 output block itself is the accumulator (its block
       index is constant across j)."""
    direct = len(scratch) == 0
    acc_ref = o_ref if direct else scratch[0]
    j = pl.program_id(1)

    @pl.when(j == 0)
    def _():
        acc_ref[...] = jnp.zeros_like(acc_ref)

    x = x_ref[...]                                                     # (TM, D)      bf16
    # Fused gate projections: one MXU pass over x for both W1 and W2 dff-tiles.
    y = jnp.dot(x, w12_ref[...], preferred_element_type=jnp.float32)   # (TM, 2*TDFF) f32
    y = y + b12_ref[...]
    half = y.shape[-1] // 2
    x1 = y[:, :half]
    x2 = y[:, half:]
    # SwiGLU gating in f32 (sigmoid on the EUP, multiplies on the VPU).
    h = (x1 * jax.nn.sigmoid(x1)) * x2                                 # (TM, TDFF)   f32
    # Partial contraction over this dff tile, accumulated in f32.
    acc_ref[...] += jnp.dot(h.astype(w3_ref.dtype), w3_ref[...],
                            preferred_element_type=jnp.float32)

    @pl.when(j == pl.num_programs(1) - 1)
    def _():
        if direct:                                    # f32 output: acc IS o_ref
            o_ref[...] += b3_ref[...]
        else:                                         # narrow output: one final cast
            o_ref[...] = (acc_ref[...] + b3_ref[...]).astype(o_ref.dtype)


# ----------------------------------------------------------------------------
# tiling / budgeting helpers
# ----------------------------------------------------------------------------
def _tpu_vmem_capacity_bytes():
    try:
        return int(getattr(pltpu.get_tpu_info(), "vmem_capacity_bytes"))
    except Exception:
        return 64 * _MIB            # conservative fallback: v7x per-TensorCore size


def _largest_divisor(n, candidates, prefer_multi=False):
    if prefer_multi:
        for c in candidates:
            if n >= c and n % c == 0 and n // c >= 2:
                return c
    for c in candidates:
        if n >= c and n % c == 0:
            return c
    return None


def _choose_row_tile(M, candidates):
    """Return (tm, padded_M).  Prefers >=2 row tiles (megacore sharding on v7x)."""
    tm = _largest_divisor(M, candidates, prefer_multi=True)
    if tm is not None:
        return tm, M
    if M <= candidates[-1]:
        return M, M                                   # small M: full-extent block
    base = candidates[-1]
    Mp = -(-M // base) * base                         # pad rows to a tile multiple
    tm = _largest_divisor(Mp, candidates, prefer_multi=True) or base
    return tm, Mp


def _choose_dff_tile(dff, candidates):
    t = _largest_divisor(dff, candidates)
    return t if t is not None else dff


def _working_set_bytes(tm, tdff, d_model, depth, out_bytes, direct):
    bf = 2
    ws = (2 * tm * d_model * bf             # x tile, double-buffered
          + 2 * d_model * (2 * tdff) * bf   # fused W1||W2 tile
          + 2 * tdff * depth * bf           # W3 tile
          + 2 * (2 * tdff) * 4              # packed b1||b2
          + 2 * depth * 4                   # b3
          + 2 * tm * depth * out_bytes)     # output block
    if not direct:
        ws += tm * depth * 4                # f32 accumulator scratch
    return ws


# ----------------------------------------------------------------------------
# wrapper
# ----------------------------------------------------------------------------
def glu_variant(x, w1, b1, w2, b2, w3, b3, *, tile_m=None, tile_dff=None,
                out_dtype=None, vmem_limit_bytes=None):
    """SwiGLU FFN:  out = (silu(x@W1 + b1) * (x@W2 + b2)) @ W3 + b3.

    x : [..., d_model]; w1, w2 : [d_model, dff]; w3 : [dff, depth]  (pre-transposed
    vs. PyTorch's [out, in]).  For best performance keep x and the weights in bf16
    persistently (the casts below are then no-ops); the W1||W2 packing is weight-only
    and is hoisted/constant-folded under jit.
    """
    orig_shape = x.shape
    d_model, dff = w1.shape
    depth = w3.shape[1]
    assert orig_shape[-1] == d_model
    assert w2.shape == (d_model, dff) and w3.shape[0] == dff

    out_dtype = jax.dtypes.canonicalize_dtype(out_dtype if out_dtype is not None
                                              else x.dtype)
    out_bytes = out_dtype.itemsize
    direct = out_dtype == jnp.dtype(jnp.float32)        # accumulate directly in o_ref

    M = int(np.prod(orig_shape[:-1])) if orig_shape[:-1] else 1

    # ---- generation-aware VMEM budget & tile candidates ---------------------
    vmem_phys = _tpu_vmem_capacity_bytes()
    small_vmem = vmem_phys <= 64 * _MIB                  # v7x-like (64 MiB / TC)
    if vmem_limit_bytes is None:
        vmem_limit_bytes = 48 * _MIB if small_vmem else 96 * _MIB
    budget = int(vmem_limit_bytes * 0.75)                # headroom for compiler scratch

    # Prefer 256-aligned tiles (2x256^2 MXU on v6e/v7x); 1024-row tiles only on the
    # big-VMEM parts (v5e/v6e) where they halve total weight streaming from HBM.
    row_candidates = (512, 256, 128) if small_vmem else (1024, 512, 256, 128)
    dff_candidates = (512, 256, 128)

    if tile_m is None:
        tm, M_pad = _choose_row_tile(M, row_candidates)
    else:
        tm = int(tile_m)
        M_pad = -(-M // tm) * tm                         # pad instead of dropping rows
    if tile_dff is None:
        tdff = _choose_dff_tile(dff, dff_candidates)
    else:
        tdff = int(tile_dff)
        if dff % tdff != 0:
            raise ValueError(f"tile_dff={tdff} must divide dff={dff}")

    # Shrink tiles until the double-buffered working set fits the VMEM budget.
    while (_working_set_bytes(tm, tdff, d_model, depth, out_bytes, direct) > budget
           and (tdff > 128 or tm > 128)):
        if tdff > 128 and tdff % 2 == 0 and dff % (tdff // 2) == 0:
            tdff //= 2
        elif tm > 128 and tm % 2 == 0 and M_pad % (tm // 2) == 0:
            tm //= 2
        else:
            break
    # TODO(synk): add a depth-tiling grid axis if depth ever grows so large that the
    # (tm, depth) output block alone exceeds the VMEM budget.

    # ---- operand prep (no-ops if the caller already keeps bf16 params) ------
    def to_bf16(a):
        return a if a.dtype == jnp.bfloat16 else a.astype(jnp.bfloat16)

    x2d = x.reshape(M, d_model)
    if M_pad != M:
        x2d = jnp.pad(x2d, ((0, M_pad - M), (0, 0)))
    x_bf = to_bf16(x2d)

    nj = dff // tdff
    # Pack W1 || W2 per dff tile -> one (d_model, 2*tdff) MXU operand per grid step.
    w12 = jnp.concatenate(
        [to_bf16(w1).reshape(d_model, nj, tdff),
         to_bf16(w2).reshape(d_model, nj, tdff)], axis=2).reshape(d_model, 2 * dff)
    b12 = jnp.concatenate(
        [b1.astype(jnp.float32).reshape(nj, tdff),
         b2.astype(jnp.float32).reshape(nj, tdff)], axis=1).reshape(1, 2 * dff)
    w3_bf = to_bf16(w3)
    b3r = b3.astype(jnp.float32).reshape(1, depth)

    grid = (M_pad // tm, nj)

    out = pl.pallas_call(
        _swiglu_kernel,
        grid=grid,
        in_specs=[
            pl.BlockSpec((tm, d_model), lambda i, j: (i, 0)),        # x rows
            pl.BlockSpec((d_model, 2 * tdff), lambda i, j: (0, j)),  # W1||W2 dff tile
            pl.BlockSpec((tdff, depth), lambda i, j: (j, 0)),        # W3 dff tile
            pl.BlockSpec((1, 2 * tdff), lambda i, j: (0, j)),        # b1||b2 dff tile
            pl.BlockSpec((1, depth), lambda i, j: (0, 0)),           # b3
        ],
        out_specs=pl.BlockSpec((tm, depth), lambda i, j: (i, 0)),
        out_shape=jax.ShapeDtypeStruct((M_pad, depth), out_dtype),
        scratch_shapes=() if direct else [pltpu.VMEM((tm, depth), jnp.float32)],
        compiler_params=pltpu.CompilerParams(
            dimension_semantics=("parallel", "arbitrary"),
            vmem_limit_bytes=int(vmem_limit_bytes),
        ),
    )(x_bf, w12, w3_bf, b12, b3r)

    if M_pad != M:
        out = out[:M]
    return out.reshape(*orig_shape[:-1], depth)


# ----------------------------------------------------------------------------
# pure-JAX reference (f32)
# ----------------------------------------------------------------------------
def reference_glu(x, w1, b1, w2, b2, w3, b3):
    x1 = x @ w1 + b1
    x1 = x1 * jax.nn.sigmoid(x1)          # SiLU
    x2 = x @ w2 + b2
    return (x1 * x2) @ w3 + b3


# ----------------------------------------------------------------------------
# deterministic tests
# ----------------------------------------------------------------------------
if __name__ == "__main__":
    def xavier(k, fi, fo):
        lim = math.sqrt(6.0 / (fi + fo))
        return jax.random.uniform(k, (fi, fo), jnp.float32, -lim, lim)

    def make_params(key, d_model, dff, depth):
        k1, k2, k3, kb1, kb2, kb3 = jax.random.split(key, 6)
        # weights stored pre-transposed [in, out]; small non-zero biases so the
        # bias path is actually exercised.
        return (xavier(k1, d_model, dff),
                0.05 * jax.random.normal(kb1, (dff,), jnp.float32),
                xavier(k2, d_model, dff),
                0.05 * jax.random.normal(kb2, (dff,), jnp.float32),
                xavier(k3, dff, depth),
                0.05 * jax.random.normal(kb3, (depth,), jnp.float32))

    key = jax.random.PRNGKey(0)
    k_small, k_big, kx1, kx2 = jax.random.split(key, 4)

    # --- small-shape check (blocks == full arrays, single grid step) ---------
    B, S, d_model, dff, depth = 2, 8, 32, 64, 32
    params = make_params(k_small, d_model, dff, depth)
    x = jax.random.normal(kx1, (B, S, d_model), jnp.float32)

    out = jax.block_until_ready(glu_variant(x, *params))
    assert out.shape == (B, S, depth) and out.dtype == jnp.float32
    ref = reference_glu(x, *params)
    np.testing.assert_allclose(np.asarray(out), np.asarray(ref), rtol=2e-2, atol=2e-2)

    # same inputs, bf16 output (exercises the f32-scratch finalize path)
    out_bf = jax.block_until_ready(glu_variant(x, *params, out_dtype=jnp.bfloat16))
    assert out_bf.dtype == jnp.bfloat16
    np.testing.assert_allclose(np.asarray(out_bf, dtype=np.float32), np.asarray(ref),
                               rtol=3e-2, atol=3e-2)

    # --- tiled-path check: multiple row tiles + dff reduction + row padding --
    B, S, d_model, dff, depth = 2, 300, 256, 1024, 256   # M=600 -> padded to 640 rows
    params = make_params(k_big, d_model, dff, depth)
    x = jax.random.normal(kx2, (B, S, d_model), jnp.float32)

    out = jax.block_until_ready(glu_variant(x, *params))
    assert out.shape == (B, S, depth)
    ref = reference_glu(x, *params)
    np.testing.assert_allclose(np.asarray(out), np.asarray(ref), rtol=2e-2, atol=2e-2)

    print("KERNEL_OK")
</pallas_src>

<mosaic_0001>
module attributes {stable_mosaic.version = 11 : i64} {
  func.func @_swiglu_kernel(%arg0: i32, %arg1: i32, %arg2: memref<16x32xbf16, #tpu.memory_space<vmem>>, %arg3: memref<32x128xbf16, #tpu.memory_space<vmem>>, %arg4: memref<64x32xbf16, #tpu.memory_space<vmem>>, %arg5: memref<1x128xf32, #tpu.memory_space<vmem>>, %arg6: memref<1x32xf32, #tpu.memory_space<vmem>>, %arg7: memref<16x32xf32, #tpu.memory_space<vmem>>) attributes {dimension_semantics = [#tpu.dimension_semantics<parallel>, #tpu.dimension_semantics<arbitrary>], iteration_bounds = array<i64: 1, 1>, scalar_prefetch = 0 : i64, scratch_operands = 0 : i64, tpu.core_type = #tpu.core_type<tc>, window_params = [{transform_indices = @transform_0, window_bounds = array<i64: 16, 32>}, {transform_indices = @transform_1, window_bounds = array<i64: 32, 128>}, {transform_indices = @transform_2, window_bounds = array<i64: 64, 32>}, {transform_indices = @transform_3, window_bounds = array<i64: 1, 128>}, {pipeline_mode = #tpu.pipeline_mode<synchronous>, transform_indices = @transform_4, window_bounds = array<i64: 1, 32>}, {transform_indices = @transform_5, window_bounds = array<i64: 16, 32>}]} {
    %c0_i32 = arith.constant 0 : i32
    %0 = arith.cmpi eq, %arg1, %c0_i32 : i32
    %1 = arith.extui %0 : i1 to i32
    %c0_i32_0 = arith.constant 0 : i32
    %2 = arith.cmpi ne, %1, %c0_i32_0 : i32
    scf.if %2 {
      %cst_16 = arith.constant 0.000000e+00 : f32
      %27 = vector.broadcast %cst_16 : f32 to vector<16x32xf32>
      %c0_17 = arith.constant 0 : index
      %c0_18 = arith.constant 0 : index
      %28 = vector.load %arg7[%c0_17, %c0_18] : memref<16x32xf32, #tpu.memory_space<vmem>>, vector<16x32xf32>
      tpu.vector_store %arg7[%c0_17, %c0_18], %27 {strides = array<i32>} : memref<16x32xf32, #tpu.memory_space<vmem>>, vector<16x32xf32>,
    } else {
    }
    %c0 = arith.constant 0 : index
    %c0_1 = arith.constant 0 : index
    %3 = vector.load %arg2[%c0, %c0_1] : memref<16x32xbf16, #tpu.memory_space<vmem>>, vector<16x32xbf16>
    %c0_2 = arith.constant 0 : index
    %c0_3 = arith.constant 0 : index
    %4 = vector.load %arg3[%c0_2, %c0_3] : memref<32x128xbf16, #tpu.memory_space<vmem>>, vector<32x128xbf16>
    %cst = arith.constant dense<0.000000e+00> : vector<16x128xf32>
    %5 = tpu.matmul %3, %4, %cst {dimension_numbers = #tpu.dot_dimension_numbers<[1], [0], [0], [1], [0, 0, 1, 1], [], []>} : vector<16x32xbf16>, vector<32x128xbf16>, vector<16x128xf32> -> vector<16x128xf32>
    %c0_4 = arith.constant 0 : index
    %c0_5 = arith.constant 0 : index
    %6 = vector.load %arg5[%c0_4, %c0_5] : memref<1x128xf32, #tpu.memory_space<vmem>>, vector<1x128xf32>
    %7 = vector.broadcast %6 : vector<1x128xf32> to vector<16x128xf32>
    %8 = arith.addf %5, %7 : vector<16x128xf32>
    %9 = vector.extract_strided_slice %8 {offsets = [0, 0], sizes = [16, 64], strides = [1, 1]} : vector<16x128xf32> to vector<16x64xf32>
    %10 = vector.extract_strided_slice %8 {offsets = [0, 64], sizes = [16, 64], strides = [1, 1]} : vector<16x128xf32> to vector<16x64xf32>
    %11 = arith.negf %9 : vector<16x64xf32>
    %12 = math.exp %11 : vector<16x64xf32>
    %cst_6 = arith.constant 1.000000e+00 : f32
    %13 = vector.broadcast %cst_6 : f32 to vector<16x64xf32>
    %14 = arith.addf %13, %12 : vector<16x64xf32>
    %15 = arith.divf %13, %14 : vector<16x64xf32>
    %16 = arith.mulf %9, %15 : vector<16x64xf32>
    %17 = arith.mulf %16, %10 : vector<16x64xf32>
    %c0_7 = arith.constant 0 : index
    %c0_8 = arith.constant 0 : index
    %18 = vector.load %arg7[%c0_7, %c0_8] : memref<16x32xf32, #tpu.memory_space<vmem>>, vector<16x32xf32>
    %19 = arith.truncf %17 : vector<16x64xf32> to vector<16x64xbf16>
    %c0_9 = arith.constant 0 : index
    %c0_10 = arith.constant 0 : index
    %20 = vector.load %arg4[%c0_9, %c0_10] : memref<64x32xbf16, #tpu.memory_space<vmem>>, vector<64x32xbf16>
    %cst_11 = arith.constant dense<0.000000e+00> : vector<16x32xf32>
    %21 = tpu.matmul %19, %20, %cst_11 {dimension_numbers = #tpu.dot_dimension_numbers<[1], [0], [0], [1], [0, 0, 1, 1], [], []>} : vector<16x64xbf16>, vector<64x32xbf16>, vector<16x32xf32> -> vector<16x32xf32>
    %22 = arith.addf %18, %21 : vector<16x32xf32>
    %c0_12 = arith.constant 0 : index
    %c0_13 = arith.constant 0 : index
    %23 = vector.load %arg7[%c0_12, %c0_13] : memref<16x32xf32, #tpu.memory_space<vmem>>, vector<16x32xf32>
    tpu.vector_store %arg7[%c0_12, %c0_13], %22 {strides = array<i32>} : memref<16x32xf32, #tpu.memory_space<vmem>>, vector<16x32xf32>,
    %c0_i32_14 = arith.constant 0 : i32
    %24 = arith.cmpi eq, %arg1, %c0_i32_14 : i32
    %25 = arith.extui %24 : i1 to i32
    %c0_i32_15 = arith.constant 0 : i32
    %26 = arith.cmpi ne, %25, %c0_i32_15 : i32
    scf.if %26 {
      %c0_16 = arith.constant 0 : index
      %c0_17 = arith.constant 0 : index
      %27 = vector.load %arg7[%c0_16, %c0_17] : memref<16x32xf32, #tpu.memory_space<vmem>>, vector<16x32xf32>
      %c0_18 = arith.constant 0 : index
      %c0_19 = arith.constant 0 : index
      %28 = vector.load %arg6[%c0_18, %c0_19] : memref<1x32xf32, #tpu.memory_space<vmem>>, vector<1x32xf32>
      %29 = vector.broadcast %28 : vector<1x32xf32> to vector<16x32xf32>
      %30 = arith.addf %27, %29 : vector<16x32xf32>
      %c0_20 = arith.constant 0 : index
      %c0_21 = arith.constant 0 : index
      %31 = vector.load %arg7[%c0_20, %c0_21] : memref<16x32xf32, #tpu.memory_space<vmem>>, vector<16x32xf32>
      tpu.vector_store %arg7[%c0_20, %c0_21], %30 {strides = array<i32>} : memref<16x32xf32, #tpu.memory_space<vmem>>, vector<16x32xf32>,
    } else {
    }
    return
  }
  func.func @transform_0(%arg0: i32, %arg1: i32) -> (i32, i32) {
    %c0_i32 = arith.constant 0 : i32
    %c0_i32_0 = arith.constant 0 : i32
    return %arg0, %c0_i32 : i32, i32
  }
  func.func @transform_1(%arg0: i32, %arg1: i32) -> (i32, i32) {
    %c0_i32 = arith.constant 0 : i32
    %c0_i32_0 = arith.constant 0 : i32
    return %c0_i32, %arg1 : i32, i32
  }
  func.func @transform_2(%arg0: i32, %arg1: i32) -> (i32, i32) {
    %c0_i32 = arith.constant 0 : i32
    %c0_i32_0 = arith.constant 0 : i32
    return %arg1, %c0_i32 : i32, i32
  }
  func.func @transform_3(%arg0: i32, %arg1: i32) -> (i32, i32) {
    %c0_i32 = arith.constant 0 : i32
    %c0_i32_0 = arith.constant 0 : i32
    return %c0_i32, %arg1 : i32, i32
  }
  func.func @transform_4(%arg0: i32, %arg1: i32) -> (i32, i32) {
    %c0_i32 = arith.constant 0 : i32
    %c0_i32_0 = arith.constant 0 : i32
    %c0_i32_1 = arith.constant 0 : i32
    return %c0_i32, %c0_i32_0 : i32, i32
  }
  func.func @transform_5(%arg0: i32, %arg1: i32) -> (i32, i32) {
    %c0_i32 = arith.constant 0 : i32
    %c0_i32_0 = arith.constant 0 : i32
    return %arg0, %c0_i32 : i32, i32
  }
}

</mosaic_0001>

<bundles_post_ra>
// kernel: tpu_custom_call.1
= control target key start
LH: loop header
LB: loop body
LE: loop exit
PB: predicated region body
PF: predicated region fallthrough
CT: control target
= control target key end

     0   :  { %v328_v1 = vmov 0.0   ;;  %vm329_vm0 = vmmov 0   ;;  %vm26_vm1 = vcmask 261120   ;;  %s401_s0 = inlined_call_operand.vmem [shape: bf16[16,32], index: 0, kind: input, shape index: {}]   ;;  %s402_s1 = inlined_call_operand.vmem [shape: bf16[32,128], index: 1, kind: input, shape index: {}]   ;;  %s403_s2 = inlined_call_operand.vmem [shape: bf16[64,32], index: 2, kind: input, shape index: {}]   ;;  %s404_s3 = inlined_call_operand.vmem [shape: f32[1,128], index: 3, kind: input, shape index: {}]   ;;  %s405_s4 = inlined_call_operand.vmem [shape: f32[1,32], index: 4, kind: input, shape index: {}]   ;;  %s406_s5 = inlined_call_operand.hbm [shape: f32[16,32], index: 5, kind: output, shape index: {}]  }
   0x1   :  { %v291_v0 = vld [vmem:[%s402_s1 + $0x8] sm:$0xff]   ;;  %265 = vmatprep.subr.bf16.mxu0 %v328_v1  ;;  %273 = vmatprep.subr.bf16.mxu1 %v328_v1  ;;  %v292_v2 = vld [vmem:[%s402_s1] sm:$0xff]   ;;  %27 = vst.msk [vmem:[#allocation2] sm:$0xff] %vm26_vm1, %v328_v1  ;;  %28 = vst.msk [vmem:[#allocation2 + $0x8] sm:$0xff] %vm26_vm1, %v328_v1 }
   0x2   :  { %266 = vmatpush3.bf16.msra.mxu0 %v291_v0  ;;  %269 = vmatprep.mubr.msk.bf16.mxu0 %vm329_vm0, %v328_v1  ;;  %v293_v3 = vld [vmem:[%s401_s0] sm:$0xff]  }
   0x3   :  { %267 = vmatprep.subr.bf16.mxu0 %v328_v1  ;;  %281 = vmatprep.mubr.msk.bf16.mxu1 %vm329_vm0, %v328_v1 }
   0x6   :  { %268 = vmatpush3.bf16.msra.mxu0 %v292_v2 }
   0x7   :  { %10 = vsyncpa [#allocation3], 0  ;;  %v294_v4 = vld [vmem:[%s403_s2 + $0x18] sm:$0xff]   ;;  %v295_v5 = vld [vmem:[%s403_s2 + $0x10] sm:$0xff]   ;;  %s330_s7 = smov 64   ;;  %vm163_vm2 = vcmask 523264  }
   0x8   :  { %274 = vmatpush3.bf16.msra.mxu1 %v294_v4  ;;  %v296_v6 = vld [vmem:[%s403_s2 + $0x8] sm:$0xff]   ;;  %v297_v7 = vld [vmem:[%s403_s2] sm:$0xff]   ;;  %s331_s8 = smov [#allocation2]  }
   0x9   :  { %270 = vmatmul.mubr.msk.bf16.vlgmr.msra.gmra.mxu0 %vm26_vm1, %v293_v3  ;;  %275 = vmatprep.subr.bf16.mxu1 %v328_v1  ;;  %v244_v8 = vld [vmem:[%s404_s3] ss:$0 sm:$0xff]  ;;  %v129_v34 = vld [vmem:[#allocation2 + $0x8] sm:$0xff]  ;;  %s233_s9 = sshll.u32 %s331_s8, 4  ;;  %s234_s9 = int_to_ptr.vmem [resolvable:$true] %s233_s9 }
   0xa   :  { %v128_v30 = vld [vmem:[#allocation2] sm:$0xff]  ;;  %s306_s10 = scalar_lea.vmem %s234_s9, 256  ;;  %p311_p1 = scmp.lt.s32.totalorder %s234_s9, %s234_s9 }
   0xb   :  { %v256_v38 = vld [vmem:[%s405_s4] ss:$0 sm:$0xff]  ;;  %p307_p0 = scmp.ne.s32.totalorder %s234_s9, %s306_s10  ;;  %p312_p2 = scmp.lt.s32.totalorder %s306_s10, %s306_s10 }
   0xc   :  { %276 = vmatpush3.bf16.msra.mxu1 %v295_v5 }
   0xd   :  { %277 = vmatprep.subr.bf16.mxu1 %v328_v1  ;;  %p313_p3 = por %p312_p2, %p311_p1 }
   0xf   :  { %p314_p4 = pnand %p313_p3, %p307_p0 }
  0x10   :  { %278 = vmatpush3.bf16.msra.mxu1 %v296_v6 }
  0x11   :  { %279 = vmatprep.subr.bf16.mxu1 %v328_v1 }
  0x14   :  { %280 = vmatpush3.bf16.msra.mxu1 %v297_v7 }
  0xc9   :  { %v97_v9 = vpop.f32.mrf.mxu0 }
  0xca   :  { %v98_v10 = vadd.f32 %v244_v8, %v97_v9 }
  0xcb   :  { %v271_v11 = vpop.f32.mrf.mxu0 }
  0xcc   :  { %120 = vrot.lane.b32.xlu0 %v98_v10, %s330_s7  ;;  %v249_v15 = vmul.f32 -1.442695, %v98_v10 }
  0xcd   :  { %v100_v12 = vpop.f32.mrf.mxu0 }
  0xce   :  { %v101_v13 = vadd.f32 %v244_v8, %v100_v12  ;;  %298 = vpow2.f32 %v249_v15 }
  0xcf   :  { %v272_v14 = vpop.f32.mrf.mxu0 }
  0xd0   :  { %122 = vrot.lane.b32.xlu0 %v101_v13, %s330_s7  ;;  %v250_v16 = vmul.f32 -1.442695, %v101_v13 }
  0xd2   :  { %300 = vpow2.f32 %v250_v16 }
  0xdb   :  { %v299_v17 = vpop.eup %298 }
  0xdc   :  { %v110_v19 = vadd.f32 1.0, %v299_v17 }
  0xde   :  { %302 = vrcp.f32 %v110_v19 }
  0xdf   :  { %v301_v18 = vpop.eup %300 }
  0xe0   :  { %v111_v20 = vadd.f32 1.0, %v301_v18 }
  0xe2   :  { %304 = vrcp.f32 %v111_v20 }
  0xeb   :  { %v303_v21 = vpop.eup %302 }
  0xec   :  { %v116_v24 = vmul.f32 %v303_v21, %v98_v10 }
  0xef   :  { %v305_v22 = vpop.eup %304 }
  0xf0   :  { %v117_v25 = vmul.f32 %v305_v22, %v101_v13 }
 0x13e   :  { %v121_v23 = vpop.permute.xlu0 %120 }
 0x13f   :  { %v126_v27 = vmul.f32 %v121_v23, %v116_v24 }
 0x142   :  { %v123_v26 = vpop.permute.xlu0 %122 }
 0x143   :  { %v127_v28 = vmul.f32 %v123_v26, %v117_v25 }
 0x145   :  { %v130_v29 = vpack.c.bf16 %v127_v28, %v126_v27 }
 0x147   :  { %282 = vmatmul.mubr.msk.bf16.vlgmr.msra.gmra.mxu1 %vm163_vm2, %v130_v29 }
 0x207   :  { %v201_v31 = vpop.f32.mrf.mxu1 }
 0x208   :  { %v208_v32 = vadd.f32 %v201_v31, %v128_v30 }
 0x209   :  { %v283_v33 = vpop.f32.mrf.mxu1 }
 0x20a   :  { %210 = vst.msk [vmem:[#allocation2] sm:$0xff] %vm26_vm1, %v208_v32 }
 0x20b   :  { %v204_v35 = vpop.f32.mrf.mxu1 }
 0x20c   :  { %v209_v36 = vadd.f32 %v204_v35, %v129_v34 }
 0x20d   :  { %v284_v37 = vpop.f32.mrf.mxu1 }
 0x20e   :  { %211 = vst.msk [vmem:[#allocation2 + $0x8] sm:$0xff] %vm26_vm1, %v209_v36 }
 0x211   :  { %v215_v39 = vld [vmem:[#allocation2] sm:$0xff] }
 0x212   :  { %v224_v40 = vadd.f32 %v256_v38, %v215_v39 }
 0x214   :  { %226 = vst.msk [vmem:[#allocation2] sm:$0xff] %vm26_vm1, %v224_v40 }
 0x215   :  { %v216_v41 = vld [vmem:[#allocation2 + $0x8] sm:$0xff] }
 0x216   :  { %v225_v42 = vadd.f32 %v256_v38, %v216_v41 }
 0x218   :  { %227 = vst.msk [vmem:[#allocation2 + $0x8] sm:$0xff] %vm26_vm1, %v225_v42 }
 0x219   :  { %317 = shalt.err (!%p314_p4)
}
 0x21a   :  { %s332_s11 = smov 128   ;;  %s333_s4 = smov 8  }
 0x21b   :  { %239 = dma.vmem_to_hbm [thread:$0]  %s234_s9, 256, %s406_s5, [#allocation3], %s332_s11, %s332_s11, %s333_s4  }
 0x21c   :  { %326 = dma.done.wait [#allocation3], 256  }
 0x21d   :  { %327 = vsyncadd [#allocation3], 4294967040 }
 0x21e   :  { %243 = vsyncpa [#allocation3], 1 }

</bundles_post_ra>
